<compile_context>
chip_gen: v5e
topology: v5e:2x2
jax: 0.10.0
libtpu: 0.0.40
codegen_flags: <defaults>
</compile_context>

<pallas_src>
import jax
import jax.numpy as jnp
from jax.experimental import pallas as pl
from jax.experimental.pallas import tpu as pltpu


def _round_up(x: int, m: int) -> int:
    return ((x + m - 1) // m) * m


def skip_linear_kernel(x_ref, w_ref, b_ref, o_ref):
    """o = x @ W + b + x  (residual / skip connection around a Linear layer)."""
    x = x_ref[...]                                                    # (tm, D), storage dtype
    y = jnp.dot(x, w_ref[...], preferred_element_type=jnp.float32)   # MXU, f32 accumulate
    y = y + b_ref[...].astype(jnp.float32)                            # bias broadcast (1, D)
    y = y + x.astype(jnp.float32)                                     # residual add in f32
    o_ref[...] = y.astype(o_ref.dtype)


def _choose_tile(M, D, x_itemsize, w_itemsize, out_itemsize, tm_req, data_budget):
    """Largest VMEM-safe row tile <= tm_req; keep >=2 grid steps when possible."""

    def footprint(tm):
        w_bytes = D * D * w_itemsize          # resident weight (single-buffered)
        b_bytes = D * w_itemsize              # resident bias
        x_bytes = 2 * tm * D * x_itemsize     # double-buffered input tile
        o_bytes = 2 * tm * D * out_itemsize   # double-buffered output tile
        return w_bytes + b_bytes + x_bytes + o_bytes

    tm = max(8, (tm_req // 8) * 8)
    while tm > 8 and footprint(tm) > data_budget:
        tm //= 2
    # Small inputs: shrink the tile to the problem size, splitting into >= 2
    # grid steps when there is enough work (megacore sharding on v7x).
    if tm >= M:
        tm = _round_up(max(M // 2, 8), 8) if M >= 16 else _round_up(M, 8)
    return tm, footprint(tm)


def skip_connection(x, w, b, *, tm=512):
    """SkipConnection(Linear(D, D)) forward: layer(x) + x.

    x: [B, S, D]  (batch, sequence, hidden), f32 or bf16
    w: [D, D]     stored in-dim x out-dim, i.e. y = x @ w + b
    b: [D]
    """
    B, S, D = x.shape
    assert w.shape == (D, D) and b.shape == (D,)
    M = B * S

    x2 = x.reshape(M, D)
    b2 = b.reshape(1, D)

    data_budget = 40 * 1024 * 1024  # conservative across v5e / v6e / v7x
    tm_eff, footprint = _choose_tile(
        M, D, x.dtype.itemsize, w.dtype.itemsize, x.dtype.itemsize, tm, data_budget
    )

    # Pad the token axis to a whole number of row tiles; padded rows compute
    # just the bias and are sliced off below.
    M_pad = _round_up(M, tm_eff)
    if M_pad != M:
        x2 = jnp.pad(x2, ((0, M_pad - M), (0, 0)))

    grid = (M_pad // tm_eff,)

    cost = pl.CostEstimate(
        flops=2 * M_pad * D * D,
        transcendentals=0,
        bytes_accessed=2 * M_pad * D * x.dtype.itemsize
        + D * D * w.dtype.itemsize
        + D * b.dtype.itemsize,
    )
    vmem_limit = max(footprint + (4 << 20), 32 << 20)  # <= 44 MiB, safe on v7x too

    def build(single_buffer_consts):
        const_kwargs = (
            dict(pipeline_mode=pl.Buffered(1)) if single_buffer_consts else {}
        )
        return pl.pallas_call(
            skip_linear_kernel,
            out_shape=jax.ShapeDtypeStruct((M_pad, D), x.dtype),
            grid_spec=pltpu.PrefetchScalarGridSpec(
                num_scalar_prefetch=0,
                grid=grid,
                in_specs=[
                    pl.BlockSpec((tm_eff, D), lambda i: (i, 0)),              # x row tile
                    pl.BlockSpec((D, D), lambda i: (0, 0), **const_kwargs),   # resident weight
                    pl.BlockSpec((1, D), lambda i: (0, 0), **const_kwargs),   # resident bias
                ],
                out_specs=pl.BlockSpec((tm_eff, D), lambda i: (i, 0)),
            ),
            compiler_params=pltpu.CompilerParams(
                dimension_semantics=("parallel",),
                vmem_limit_bytes=vmem_limit,
            ),
            cost_estimate=cost,
        )

    try:
        out = build(True)(x2, w, b2)
    except Exception:
        # This JAX build rejects per-operand pipeline_mode=pl.Buffered(1):
        # fall back to default double-buffered constants (costs one extra
        # weight copy of VMEM, otherwise identical).
        out = build(False)(x2, w, b2)

    if M_pad != M:
        out = out[:M]
    return out.reshape(B, S, D)


if __name__ == "__main__":
    key = jax.random.PRNGKey(0)

    # Small ViT-ish demo: batch=2, seq=8, hidden=128 (lane-dense).
    B, S, D = 2, 8, 128
    kx, kw, kb, kx2 = jax.random.split(key, 4)
    x = jax.random.normal(kx, (B, S, D), dtype=jnp.float32)
    w = jax.random.normal(kw, (D, D), dtype=jnp.float32) * 0.02
    b = jax.random.normal(kb, (D,), dtype=jnp.float32) * 0.5

    out = jax.block_until_ready(skip_connection(x, w, b))
    ref = jnp.einsum("bsd,de->bse", x, w) + b + x
    assert out.shape == (B, S, D)
    assert jnp.allclose(out, ref, atol=2e-2, rtol=2e-2), "f32 mismatch vs reference"

    # Larger check: exercises the tm=512 tile, multi-step grid and token padding.
    B2, S2 = 2, 520  # M = 1040 -> padded to 3 x 512-row tiles
    x_big = jax.random.normal(kx2, (B2, S2, D), dtype=jnp.float32)
    out_big = jax.block_until_ready(skip_connection(x_big, w, b))
    ref_big = jnp.einsum("bsd,de->bse", x_big, w) + b + x_big
    assert out_big.shape == (B2, S2, D)
    assert jnp.allclose(out_big, ref_big, atol=2e-2, rtol=2e-2), "big f32 mismatch"

    # bf16 path (typical ViT dtype): bf16 storage, f32 accumulate in-kernel.
    xb, wb, bb = (t.astype(jnp.bfloat16) for t in (x, w, b))
    out_bf = jax.block_until_ready(skip_connection(xb, wb, bb))
    ref_bf = (
        jnp.einsum("bsd,de->bse", xb.astype(jnp.float32), wb.astype(jnp.float32))
        + bb.astype(jnp.float32)
        + xb.astype(jnp.float32)
    ).astype(jnp.bfloat16)
    assert jnp.allclose(
        out_bf.astype(jnp.float32), ref_bf.astype(jnp.float32), atol=5e-2, rtol=5e-2
    ), "bf16 mismatch vs reference"

    print("KERNEL_OK")
</pallas_src>

<mosaic_0001>
module attributes {stable_mosaic.version = 11 : i64} {
  func.func @skip_linear_kernel(%arg0: i32, %arg1: memref<8x128xf32, #tpu.memory_space<vmem>>, %arg2: memref<128x128xf32, #tpu.memory_space<vmem>>, %arg3: memref<1x128xf32, #tpu.memory_space<vmem>>, %arg4: memref<8x128xf32, #tpu.memory_space<vmem>>) attributes {dimension_semantics = [#tpu.dimension_semantics<parallel>], iteration_bounds = array<i64: 2>, scalar_prefetch = 0 : i64, scratch_operands = 0 : i64, tpu.core_type = #tpu.core_type<tc>, window_params = [{transform_indices = @transform_0, window_bounds = array<i64: 8, 128>}, {pipeline_mode = #tpu.pipeline_mode<synchronous>, transform_indices = @transform_1, window_bounds = array<i64: 128, 128>}, {pipeline_mode = #tpu.pipeline_mode<synchronous>, transform_indices = @transform_2, window_bounds = array<i64: 1, 128>}, {transform_indices = @transform_3, window_bounds = array<i64: 8, 128>}]} {
    %c0 = arith.constant 0 : index
    %c0_0 = arith.constant 0 : index
    %0 = vector.load %arg1[%c0, %c0_0] : memref<8x128xf32, #tpu.memory_space<vmem>>, vector<8x128xf32>
    %c0_1 = arith.constant 0 : index
    %c0_2 = arith.constant 0 : index
    %1 = vector.load %arg2[%c0_1, %c0_2] : memref<128x128xf32, #tpu.memory_space<vmem>>, vector<128x128xf32>
    %cst = arith.constant dense<0.000000e+00> : vector<8x128xf32>
    %2 = tpu.matmul %0, %1, %cst {dimension_numbers = #tpu.dot_dimension_numbers<[1], [0], [0], [1], [0, 0, 1, 1], [], []>} : vector<8x128xf32>, vector<128x128xf32>, vector<8x128xf32> -> vector<8x128xf32>
    %c0_3 = arith.constant 0 : index
    %c0_4 = arith.constant 0 : index
    %3 = vector.load %arg3[%c0_3, %c0_4] : memref<1x128xf32, #tpu.memory_space<vmem>>, vector<1x128xf32>
    %4 = vector.broadcast %3 : vector<1x128xf32> to vector<8x128xf32>
    %5 = arith.addf %2, %4 : vector<8x128xf32>
    %6 = arith.addf %5, %0 : vector<8x128xf32>
    %c0_5 = arith.constant 0 : index
    %c0_6 = arith.constant 0 : index
    %7 = vector.load %arg4[%c0_5, %c0_6] : memref<8x128xf32, #tpu.memory_space<vmem>>, vector<8x128xf32>
    tpu.vector_store %arg4[%c0_5, %c0_6], %6 {strides = array<i32>} : memref<8x128xf32, #tpu.memory_space<vmem>>, vector<8x128xf32>,
    return
  }
  func.func @transform_0(%arg0: i32) -> (i32, i32) {
    %c0_i32 = arith.constant 0 : i32
    %c0_i32_0 = arith.constant 0 : i32
    return %arg0, %c0_i32 : i32, i32
  }
  func.func @transform_1(%arg0: i32) -> (i32, i32) {
    %c0_i32 = arith.constant 0 : i32
    %c0_i32_0 = arith.constant 0 : i32
    %c0_i32_1 = arith.constant 0 : i32
    return %c0_i32, %c0_i32_0 : i32, i32
  }
  func.func @transform_2(%arg0: i32) -> (i32, i32) {
    %c0_i32 = arith.constant 0 : i32
    %c0_i32_0 = arith.constant 0 : i32
    %c0_i32_1 = arith.constant 0 : i32
    return %c0_i32, %c0_i32_0 : i32, i32
  }
  func.func @transform_3(%arg0: i32) -> (i32, i32) {
    %c0_i32 = arith.constant 0 : i32
    %c0_i32_0 = arith.constant 0 : i32
    return %arg0, %c0_i32 : i32, i32
  }
}

module attributes {stable_mosaic.version = 11 : i64} {
  func.func @skip_linear_kernel(%arg0: i32, %arg1: memref<8x128xf32, #tpu.memory_space<vmem>>, %arg2: memref<128x128xf32, #tpu.memory_space<vmem>>, %arg3: memref<1x128xf32, #tpu.memory_space<vmem>>, %arg4: memref<8x128xf32, #tpu.memory_space<vmem>>) attributes {dimension_semantics = [#tpu.dimension_semantics<parallel>], iteration_bounds = array<i64: 2>, scalar_prefetch = 0 : i64, scratch_operands = 0 : i64, tpu.core_type = #tpu.core_type<tc>, window_params = [{transform_indices = @transform_0, window_bounds = array<i64: 8, 128>}, {pipeline_mode = #tpu.pipeline_mode<synchronous>, transform_indices = @transform_1, window_bounds = array<i64: 128, 128>}, {pipeline_mode = #tpu.pipeline_mode<synchronous>, transform_indices = @transform_2, window_bounds = array<i64: 1, 128>}, {transform_indices = @transform_3, window_bounds = array<i64: 8, 128>}]} {
    %c0 = arith.constant 0 : index
    %c0_0 = arith.constant 0 : index
    %0 = vector.load %arg1[%c0, %c0_0] : memref<8x128xf32, #tpu.memory_space<vmem>>, vector<8x128xf32>
    %c0_1 = arith.constant 0 : index
    %c0_2 = arith.constant 0 : index
    %1 = vector.load %arg2[%c0_1, %c0_2] : memref<128x128xf32, #tpu.memory_space<vmem>>, vector<128x128xf32>
    %cst = arith.constant dense<0.000000e+00> : vector<8x128xf32>
    %2 = tpu.matmul %0, %1, %cst {dimension_numbers = #tpu.dot_dimension_numbers<[1], [0], [0], [1], [0, 0, 1, 1], [], []>} : vector<8x128xf32>, vector<128x128xf32>, vector<8x128xf32> -> vector<8x128xf32>
    %c0_3 = arith.constant 0 : index
    %c0_4 = arith.constant 0 : index
    %3 = vector.load %arg3[%c0_3, %c0_4] : memref<1x128xf32, #tpu.memory_space<vmem>>, vector<1x128xf32>
    %4 = vector.broadcast %3 : vector<1x128xf32> to vector<8x128xf32>
    %5 = arith.addf %2, %4 : vector<8x128xf32>
    %6 = arith.addf %5, %0 : vector<8x128xf32>
    %c0_5 = arith.constant 0 : index
    %c0_6 = arith.constant 0 : index
    %7 = vector.load %arg4[%c0_5, %c0_6] : memref<8x128xf32, #tpu.memory_space<vmem>>, vector<8x128xf32>
    tpu.vector_store %arg4[%c0_5, %c0_6], %6 {strides = array<i32>} : memref<8x128xf32, #tpu.memory_space<vmem>>, vector<8x128xf32>,
    return
  }
  func.func @transform_0(%arg0: i32) -> (i32, i32) {
    %c0_i32 = arith.constant 0 : i32
    %c0_i32_0 = arith.constant 0 : i32
    return %arg0, %c0_i32 : i32, i32
  }
  func.func @transform_1(%arg0: i32) -> (i32, i32) {
    %c0_i32 = arith.constant 0 : i32
    %c0_i32_0 = arith.constant 0 : i32
    %c0_i32_1 = arith.constant 0 : i32
    return %c0_i32, %c0_i32_0 : i32, i32
  }
  func.func @transform_2(%arg0: i32) -> (i32, i32) {
    %c0_i32 = arith.constant 0 : i32
    %c0_i32_0 = arith.constant 0 : i32
    %c0_i32_1 = arith.constant 0 : i32
    return %c0_i32, %c0_i32_0 : i32, i32
  }
  func.func @transform_3(%arg0: i32) -> (i32, i32) {
    %c0_i32 = arith.constant 0 : i32
    %c0_i32_0 = arith.constant 0 : i32
    return %arg0, %c0_i32 : i32, i32
  }
}

</mosaic_0001>

<bundles_post_ra>
// kernel: tpu_custom_call.1
= control target key start
LH: loop header
LB: loop body
LE: loop exit
PB: predicated region body
PF: predicated region fallthrough
CT: control target
= control target key end

     0   :  { %8 = vsyncpa [#allocation3], 0  ;;  %s719_s0 = inlined_call_operand.hbm [shape: f32[16,128], index: 0, kind: input, shape index: {}]   ;;  %s720_s1 = inlined_call_operand.hbm [shape: f32[128,128], index: 1, kind: input, shape index: {}]   ;;  %s721_s2 = inlined_call_operand.vmem [shape: f32[1,128], index: 2, kind: input, shape index: {}]   ;;  %s722_s3 = inlined_call_operand.hbm [shape: f32[16,128], index: 3, kind: output, shape index: {}]  }
   0x1   :  { %10 = vsyncpa [#allocation3 + $0x1], 0 }
   0x2   :  { %11 = vsyncpa [#allocation6], 0 }
   0x3   :  { %12 = vsyncpa [#allocation4], 0 }
   0x4   :  { %14 = vsyncpa [#allocation4 + $0x1], 0  ;;  %s573_s12 = smov 0   ;;  %s575_s13 = smov 0  }
   0x5   :  { %s577_s14 = smov 0   ;;  %s579_s15 = smov 0  }
   0x6 LB: > { %s130_s18 = sshll.u32 %s720_s1, 4  ;;  %s597_s19 = sadd.s32 4294967295, %s548_s15   ;;  %s548_s15 = sphi %s579_s15, %s732_s15   ;;  %s544_s14 = sphi %s577_s14, %s731_s14   ;;  %s540_s13 = sphi %s575_s13, %s730_s13   ;;  %s536_s12 = sphi %s573_s12, %s729_s12   ;;  %s131_s18 = int_to_ptr.hbm [resolvable:$true] %s130_s18 }
   0x7   : > { %p345_p0 = scmp.ge.s32.totalorder %s548_s15, 1  ;;  %p41_p1 = scmp.eq.s32.totalorder %s597_s19, 0 }
   0x8   : > { %p119_p2 = scmp.lt.s32.totalorder %s548_s15, 3  ;;  %s550_s21 = smov [#allocation5]  }
   0x9   : > { %s132_s22 = sshll.u32 %s550_s21, 4  ;;  %s551_s23 = smov 128   ;;  %s133_s22 = int_to_ptr.vmem [resolvable:$true] %s132_s22 }
   0xa   : > { %p602_p3 = pnand %p345_p0, %p119_p2  ;;  %s552_s24 = smov 8  }
   0xb   : > { %s344_s25 = sadd.s32 4294967294, %s548_s15   ;;  %s613_s26 = sadd.s32 1, %s548_s15  }
   0xc   : > { %p366_p4 = pneg %p602_p3  ;;  %s27_s27 = sadd.s32 1, %s544_s14 }
   0xd   : > { %s24_s28 = ssub.s32 %s548_s15, %s613_s26  ;;  %p34_p7 = scmp.ne.s32.totalorder %s544_s14, %s540_s13 }
   0xe   : > { %p367_p6 = pnand %p366_p4, %p41_p1  ;;  %p25_p8 = scmp.eq.s32.totalorder %s24_s28, 0 }
   0xf   : > { %p35_p9 = scmp.eq.s32.totalorder %s548_s15, 0  ;;  %p40_p10 = scmp.ne.s32.totalorder %s540_s13, %s536_s12 }
  0x10   : > { %369 = dma.hbm_to_vmem [thread:$0]  (!%p367_p6), %s131_s18, 2048, %s133_s22, [#allocation6], %s551_s23, %s551_s23, %s552_s24  }
  0x11   : > { %p106_p11 = scmp.eq.s32.totalorder %s597_s19, 1  ;;  %p629_p12 = por %p41_p1, %p40_p10 }
  0x12   : > { %s625_s29 = scalar_select %p25_p8, %s544_s14, %s27_s27  }
  0x13   : > { %p633_p13 = por %p106_p11, %p34_p7  ;;  %p112_p0 = scmp.eq.s32.totalorder %s344_s25, 1 }
  0x14   : > { %p36_p2 = por %p35_p9, %p34_p7  ;;  %s149_s5 = sand.u32 1, %s544_s14  }
  0x15   : > { %p638_p4 = por %p112_p0, %p40_p10  ;;  %p379_p6 = scmp.lt.s32.totalorder %s548_s15, 2 }
  0x16   : > { %s348_s7 = sshll.u32 %s149_s5, 3  ;;  %s349_s8 = sshll.u32 %s548_s15, 3 }
  0x17   : > { %s157_s11 = scalar_lea.hbm %s719_s0, %s349_s8  ;;  %s153_s17 = scalar_lea.vmem [#allocation2], %s348_s7 }
  0x18   : > { %s159_s16 = sshll.u32 %s157_s11, 4  ;;  %s161_s18 = sshll.u32 %s153_s17, 4  ;;  %s160_s16 = int_to_ptr.hbm [resolvable:$true] %s159_s16  ;;  %s162_s18 = int_to_ptr.vmem [resolvable:$true] %s161_s18 }
  0x19   : > { %p647_p8 = pnand %p379_p6, %p36_p2  ;;  %s150_s22 = scalar_lea.sflag [#allocation3], %s149_s5 }
  0x1a   : > { %s448_s23 = sshra.s32 %s160_s16, 4  ;;  %s455_s28 = scalar_lea.hbm %s719_s0, 16  ;;  %s449_s23 = int_to_ptr.hbm [resolvable:$true] %s448_s23 }
  0x1b   : > { %s450_s24 = scalar_lea.hbm %s449_s23, 8  ;;  %p452_p9 = pneg %p647_p8 }
  0x1c   : > { %p451_p7 = scmp.ne.s32.totalorder %s449_s23, %s450_s24  ;;  %p456_p0 = scmp.lt.s32.totalorder %s449_s23, %s719_s0 }
  0x1d   : > { %p457_p2 = scmp.lt.s32.totalorder %s455_s28, %s450_s24 }
  0x1e   : > { %p453_p10 = pnand %p452_p9, %p451_p7 }
  0x1f   : > { %p458_p6 = por %p457_p2, %p456_p0 }
  0x20   : > { %p454_p11 = pneg %p453_p10 }
  0x22   : > { %p459_p5 = pnand %p458_p6, %p454_p11 }
  0x24   : > { %462 = shalt.err (!%p459_p5)
}
  0x25   : > { %373 = dma.hbm_to_vmem [thread:$0]  (!%p647_p8), %s160_s16, 128, %s162_s18, %s150_s22  }
  0x26   : > { %170 = sbr.rel (%p602_p3) target bundleno = 211 (0xd3), region = 32  ;;  %s664_s5 = sand.u32 (!%p602_p3), 1, %s540_s13  }
  0x27   : > { %s351_s9 = sshll.u32 (!%p602_p3), %s664_s5, 3  ;;  %s173_s10 = scalar_lea.sflag (!%p602_p3), [#allocation3], %s664_s5 }
  0x28   : > { %s670_s11 = scalar_lea.vmem (!%p602_p3), [#allocation2], %s351_s9 }
  0x2b   : > { %523 = dma.done.wait (%p629_p12), %s173_s10, 128  }
  0x2c   : > { %525 = vsyncadd (%p629_p12), %s173_s10, 4294967168 }
  0x2d   : > { %527 = dma.done.wait (%p41_p1), [#allocation6], 2048  }
  0x2e   : > { %529 = vsyncadd (%p41_p1), [#allocation6], 4294965248  ;;  %v221_v0 = vld [vmem:[#allocation5 + $0x78] sm:$0xff]  ;;  %v220_v1 = vld [vmem:[#allocation5 + $0x70] sm:$0xff]  ;;  %s355_s20 = sshll.u32 %s597_s19, 3  ;;  %s204_s22 = scalar_lea.vmem [#allocation7], %s351_s9 }
  0x2f   : > { %226 = vmatpush.msra.mxu0 %v221_v0  ;;  %v219_v2 = vld [vmem:[#allocation5 + $0x68] sm:$0xff]  ;;  %v218_v3 = vld [vmem:[#allocation5 + $0x60] sm:$0xff]  ;;  %v217_v4 = vld [vmem:[#allocation5 + $0x58] sm:$0xff]  ;;  %s259_s21 = scalar_lea.hbm %s722_s3, %s355_s20  ;;  %s261_s23 = sshll.u32 %s204_s22, 4  ;;  %s262_s23 = int_to_ptr.vmem [resolvable:$true] %s261_s23 }
  0x30   : > { %v216_v5 = vld [vmem:[#allocation5 + $0x50] sm:$0xff]  ;;  %v215_v6 = vld [vmem:[#allocation5 + $0x48] sm:$0xff]  ;;  %v214_v7 = vld [vmem:[#allocation5 + $0x40] sm:$0xff]  ;;  %s263_s24 = sshll.u32 %s259_s21, 4  ;;  %s249_s19 = scalar_lea.sflag [#allocation4], %s664_s5  ;;  %s264_s24 = int_to_ptr.hbm [resolvable:$true] %s263_s24 }
  0x31   : > { %227 = vmatpush.msra.mxu0 %v220_v1  ;;  %v213_v8 = vld [vmem:[#allocation5 + $0x38] sm:$0xff]  ;;  %v212_v9 = vld [vmem:[#allocation5 + $0x30] sm:$0xff]  ;;  %v211_v10 = vld [vmem:[#allocation5 + $0x28] sm:$0xff]  ;;  %s492_s25 = sshra.s32 %s264_s24, 4  ;;  %s498_s8 = scalar_lea.hbm %s722_s3, 16  ;;  %s493_s25 = int_to_ptr.hbm [resolvable:$true] %s492_s25 }
  0x32   : > { %v210_v11 = vld [vmem:[#allocation5 + $0x20] sm:$0xff]  ;;  %v209_v12 = vld [vmem:[#allocation5 + $0x18] sm:$0xff]  ;;  %v208_v13 = vld [vmem:[#allocation5 + $0x10] sm:$0xff]  ;;  %s494_s27 = scalar_lea.hbm %s493_s25, 8  ;;  %p499_p12 = scmp.lt.s32.totalorder %s493_s25, %s722_s3 }
  0x33   : > { %228 = vmatpush.msra.mxu0 %v219_v2  ;;  %v207_v14 = vld [vmem:[#allocation5 + $0x8] sm:$0xff]  ;;  %v206_v15 = vld [vmem:[#allocation5] sm:$0xff]  ;;  %v205_v16 = vld [vmem:[%s670_s11] sm:$0xff]  ;;  %p495_p1 = scmp.ne.s32.totalorder %s493_s25, %s494_s27  ;;  %p500_p8 = scmp.lt.s32.totalorder %s498_s8, %s494_s27 }
  0x34   : > { %v417_v17 = vld [vmem:[%s721_s2] ss:$0 sm:$0xff] }
  0x35   : > { %229 = vmatpush.msra.mxu0 %v218_v3  ;;  %p496_p3 = pnand %p495_p1, %p633_p13  ;;  %p501_p7 = por %p500_p8, %p499_p12 }
  0x37   : > { %230 = vmatpush.msra.mxu0 %v217_v4  ;;  %p497_p5 = pneg %p496_p3 }
  0x39   : > { %231 = vmatpush.msra.mxu0 %v216_v5  ;;  %p502_p9 = pnand %p501_p7, %p497_p5 }
  0x3b   : > { %232 = vmatpush.msra.mxu0 %v215_v6 }
  0x3d   : > { %233 = vmatpush.msra.mxu0 %v214_v7 }
  0x3f   : > { %234 = vmatpush.msra.mxu0 %v213_v8 }
  0x41   : > { %235 = vmatpush.msra.mxu0 %v212_v9 }
  0x43   : > { %236 = vmatpush.msra.mxu0 %v211_v10 }
  0x45   : > { %237 = vmatpush.msra.mxu0 %v210_v11 }
  0x47   : > { %238 = vmatpush.msra.mxu0 %v209_v12 }
  0x49   : > { %239 = vmatpush.msra.mxu0 %v208_v13 }
  0x4b   : > { %240 = vmatpush.msra.mxu0 %v207_v14 }
  0x4d   : > { %241 = vmatpush.msra.mxu0 %v206_v15 }
  0x4e   : > { %242 = vmatmul.f32.vlgmr.msra.gmra.mxu0 %v205_v16 }
  0xcb   : > { %v243_v18 = vpop.f32.mrf.mxu0 }
  0xcc   : > { %v244_v19 = vadd.f32 %v417_v17, %v243_v18 }
  0xce   : > { %v246_v20 = vadd.f32 %v244_v19, %v205_v16 }
  0xd0   : > { %247 = vst [vmem:[%s204_s22] sm:$0xff] %v246_v20 }
  0xd1   : > { %505 = shalt.err (!%p502_p9)
}
  0xd2   : > { %364 = dma.vmem_to_hbm [thread:$0]  (%p633_p13), %s262_s23, 128, %s264_s24, %s249_s19  }
  0xd3 PF: > { %s275_s5 = sand.u32 1, %s536_s12   ;;  %p728_p10 = scmp.ge.s32.totalorder %s548_s15, 2 }
  0xd4   : > { %s276_s11 = scalar_lea.sflag [#allocation4], %s275_s5 }
  0xd5   : > { %p375_p11 = pnand %p728_p10, %p638_p4 }
  0xd7   : > { %p376_p0 = pneg %p375_p11 }
  0xd9   : > { %531 = dma.done.wait (%p376_p0), %s276_s11, 128  }
  0xda   : > { %533 = vsyncadd (%p376_p0), %s276_s11, 4294967168  ;;  %p17_p2 = scmp.ge.s32.totalorder %s613_s26, 4   ;;  %s729_s12 = smov %s540_s13 }
  0xdb   : > { %s730_s13 = smov %s544_s14  ;;  %s731_s14 = smov %s625_s29 }
  0xdc   : > { %s732_s15 = smov %s613_s26  ;;  %19 = sbr.rel (!%p17_p2) target bundleno = 6 (0x6), region = 81 }
  0xe1   :  { %282 = vsyncpa [#allocation3], 1 }
  0xe2   :  { %284 = vsyncpa [#allocation3 + $0x1], 1 }
  0xe3   :  { %285 = vsyncpa [#allocation6], 1 }
  0xe4   :  { %286 = vsyncpa [#allocation4], 1 }
  0xe5   :  { %288 = vsyncpa [#allocation4 + $0x1], 1 }

// kernel: tpu_custom_call.1
= control target key start
LH: loop header
LB: loop body
LE: loop exit
PB: predicated region body
PF: predicated region fallthrough
CT: control target
= control target key end

     0   :  { %8 = vsyncpa [#allocation3], 0  ;;  %s719_s0 = inlined_call_operand.hbm [shape: f32[16,128], index: 0, kind: input, shape index: {}]   ;;  %s720_s1 = inlined_call_operand.hbm [shape: f32[128,128], index: 1, kind: input, shape index: {}]   ;;  %s721_s2 = inlined_call_operand.vmem [shape: f32[1,128], index: 2, kind: input, shape index: {}]   ;;  %s722_s3 = inlined_call_operand.hbm [shape: f32[16,128], index: 3, kind: output, shape index: {}]  }
   0x1   :  { %10 = vsyncpa [#allocation3 + $0x1], 0 }
   0x2   :  { %11 = vsyncpa [#allocation6], 0 }
   0x3   :  { %12 = vsyncpa [#allocation4], 0 }
   0x4   :  { %14 = vsyncpa [#allocation4 + $0x1], 0  ;;  %s573_s12 = smov 0   ;;  %s575_s13 = smov 0  }
   0x5   :  { %s577_s14 = smov 0   ;;  %s579_s15 = smov 0  }
   0x6 LB: > { %s130_s18 = sshll.u32 %s720_s1, 4  ;;  %s597_s19 = sadd.s32 4294967295, %s548_s15   ;;  %s548_s15 = sphi %s579_s15, %s732_s15   ;;  %s544_s14 = sphi %s577_s14, %s731_s14   ;;  %s540_s13 = sphi %s575_s13, %s730_s13   ;;  %s536_s12 = sphi %s573_s12, %s729_s12   ;;  %s131_s18 = int_to_ptr.hbm [resolvable:$true] %s130_s18 }
   0x7   : > { %p345_p0 = scmp.ge.s32.totalorder %s548_s15, 1  ;;  %p41_p1 = scmp.eq.s32.totalorder %s597_s19, 0 }
   0x8   : > { %p119_p2 = scmp.lt.s32.totalorder %s548_s15, 3  ;;  %s550_s21 = smov [#allocation5]  }
   0x9   : > { %s132_s22 = sshll.u32 %s550_s21, 4  ;;  %s551_s23 = smov 128   ;;  %s133_s22 = int_to_ptr.vmem [resolvable:$true] %s132_s22 }
   0xa   : > { %p602_p3 = pnand %p345_p0, %p119_p2  ;;  %s552_s24 = smov 8  }
   0xb   : > { %s344_s25 = sadd.s32 4294967294, %s548_s15   ;;  %s613_s26 = sadd.s32 1, %s548_s15  }
   0xc   : > { %p366_p4 = pneg %p602_p3  ;;  %s27_s27 = sadd.s32 1, %s544_s14 }
   0xd   : > { %s24_s28 = ssub.s32 %s548_s15, %s613_s26  ;;  %p34_p7 = scmp.ne.s32.totalorder %s544_s14, %s540_s13 }
   0xe   : > { %p367_p6 = pnand %p366_p4, %p41_p1  ;;  %p25_p8 = scmp.eq.s32.totalorder %s24_s28, 0 }
   0xf   : > { %p35_p9 = scmp.eq.s32.totalorder %s548_s15, 0  ;;  %p40_p10 = scmp.ne.s32.totalorder %s540_s13, %s536_s12 }
  0x10   : > { %369 = dma.hbm_to_vmem [thread:$0]  (!%p367_p6), %s131_s18, 2048, %s133_s22, [#allocation6], %s551_s23, %s551_s23, %s552_s24  }
  0x11   : > { %p106_p11 = scmp.eq.s32.totalorder %s597_s19, 1  ;;  %p629_p12 = por %p41_p1, %p40_p10 }
  0x12   : > { %s625_s29 = scalar_select %p25_p8, %s544_s14, %s27_s27  }
  0x13   : > { %p633_p13 = por %p106_p11, %p34_p7  ;;  %p112_p0 = scmp.eq.s32.totalorder %s344_s25, 1 }
  0x14   : > { %p36_p2 = por %p35_p9, %p34_p7  ;;  %s149_s5 = sand.u32 1, %s544_s14  }
  0x15   : > { %p638_p4 = por %p112_p0, %p40_p10  ;;  %p379_p6 = scmp.lt.s32.totalorder %s548_s15, 2 }
  0x16   : > { %s348_s7 = sshll.u32 %s149_s5, 3  ;;  %s349_s8 = sshll.u32 %s548_s15, 3 }
  0x17   : > { %s157_s11 = scalar_lea.hbm %s719_s0, %s349_s8  ;;  %s153_s17 = scalar_lea.vmem [#allocation2], %s348_s7 }
  0x18   : > { %s159_s16 = sshll.u32 %s157_s11, 4  ;;  %s161_s18 = sshll.u32 %s153_s17, 4  ;;  %s160_s16 = int_to_ptr.hbm [resolvable:$true] %s159_s16  ;;  %s162_s18 = int_to_ptr.vmem [resolvable:$true] %s161_s18 }
  0x19   : > { %p647_p8 = pnand %p379_p6, %p36_p2  ;;  %s150_s22 = scalar_lea.sflag [#allocation3], %s149_s5 }
  0x1a   : > { %s448_s23 = sshra.s32 %s160_s16, 4  ;;  %s455_s28 = scalar_lea.hbm %s719_s0, 16  ;;  %s449_s23 = int_to_ptr.hbm [resolvable:$true] %s448_s23 }
  0x1b   : > { %s450_s24 = scalar_lea.hbm %s449_s23, 8  ;;  %p452_p9 = pneg %p647_p8 }
  0x1c   : > { %p451_p7 = scmp.ne.s32.totalorder %s449_s23, %s450_s24  ;;  %p456_p0 = scmp.lt.s32.totalorder %s449_s23, %s719_s0 }
  0x1d   : > { %p457_p2 = scmp.lt.s32.totalorder %s455_s28, %s450_s24 }
  0x1e   : > { %p453_p10 = pnand %p452_p9, %p451_p7 }
  0x1f   : > { %p458_p6 = por %p457_p2, %p456_p0 }
  0x20   : > { %p454_p11 = pneg %p453_p10 }
  0x22   : > { %p459_p5 = pnand %p458_p6, %p454_p11 }
  0x24   : > { %462 = shalt.err (!%p459_p5)
}
  0x25   : > { %373 = dma.hbm_to_vmem [thread:$0]  (!%p647_p8), %s160_s16, 128, %s162_s18, %s150_s22  }
  0x26   : > { %170 = sbr.rel (%p602_p3) target bundleno = 211 (0xd3), region = 32  ;;  %s664_s5 = sand.u32 (!%p602_p3), 1, %s540_s13  }
  0x27   : > { %s351_s9 = sshll.u32 (!%p602_p3), %s664_s5, 3  ;;  %s173_s10 = scalar_lea.sflag (!%p602_p3), [#allocation3], %s664_s5 }
  0x28   : > { %s670_s11 = scalar_lea.vmem (!%p602_p3), [#allocation2], %s351_s9 }
  0x2b   : > { %523 = dma.done.wait (%p629_p12), %s173_s10, 128  }
  0x2c   : > { %525 = vsyncadd (%p629_p12), %s173_s10, 4294967168 }
  0x2d   : > { %527 = dma.done.wait (%p41_p1), [#allocation6], 2048  }
  0x2e   : > { %529 = vsyncadd (%p41_p1), [#allocation6], 4294965248  ;;  %v221_v0 = vld [vmem:[#allocation5 + $0x78] sm:$0xff]  ;;  %v220_v1 = vld [vmem:[#allocation5 + $0x70] sm:$0xff]  ;;  %s355_s20 = sshll.u32 %s597_s19, 3  ;;  %s204_s22 = scalar_lea.vmem [#allocation7], %s351_s9 }
  0x2f   : > { %226 = vmatpush.msra.mxu0 %v221_v0  ;;  %v219_v2 = vld [vmem:[#allocation5 + $0x68] sm:$0xff]  ;;  %v218_v3 = vld [vmem:[#allocation5 + $0x60] sm:$0xff]  ;;  %v217_v4 = vld [vmem:[#allocation5 + $0x58] sm:$0xff]  ;;  %s259_s21 = scalar_lea.hbm %s722_s3, %s355_s20  ;;  %s261_s23 = sshll.u32 %s204_s22, 4  ;;  %s262_s23 = int_to_ptr.vmem [resolvable:$true] %s261_s23 }
  0x30   : > { %v216_v5 = vld [vmem:[#allocation5 + $0x50] sm:$0xff]  ;;  %v215_v6 = vld [vmem:[#allocation5 + $0x48] sm:$0xff]  ;;  %v214_v7 = vld [vmem:[#allocation5 + $0x40] sm:$0xff]  ;;  %s263_s24 = sshll.u32 %s259_s21, 4  ;;  %s249_s19 = scalar_lea.sflag [#allocation4], %s664_s5  ;;  %s264_s24 = int_to_ptr.hbm [resolvable:$true] %s263_s24 }
  0x31   : > { %227 = vmatpush.msra.mxu0 %v220_v1  ;;  %v213_v8 = vld [vmem:[#allocation5 + $0x38] sm:$0xff]  ;;  %v212_v9 = vld [vmem:[#allocation5 + $0x30] sm:$0xff]  ;;  %v211_v10 = vld [vmem:[#allocation5 + $0x28] sm:$0xff]  ;;  %s492_s25 = sshra.s32 %s264_s24, 4  ;;  %s498_s8 = scalar_lea.hbm %s722_s3, 16  ;;  %s493_s25 = int_to_ptr.hbm [resolvable:$true] %s492_s25 }
  0x32   : > { %v210_v11 = vld [vmem:[#allocation5 + $0x20] sm:$0xff]  ;;  %v209_v12 = vld [vmem:[#allocation5 + $0x18] sm:$0xff]  ;;  %v208_v13 = vld [vmem:[#allocation5 + $0x10] sm:$0xff]  ;;  %s494_s27 = scalar_lea.hbm %s493_s25, 8  ;;  %p499_p12 = scmp.lt.s32.totalorder %s493_s25, %s722_s3 }
  0x33   : > { %228 = vmatpush.msra.mxu0 %v219_v2  ;;  %v207_v14 = vld [vmem:[#allocation5 + $0x8] sm:$0xff]  ;;  %v206_v15 = vld [vmem:[#allocation5] sm:$0xff]  ;;  %v205_v16 = vld [vmem:[%s670_s11] sm:$0xff]  ;;  %p495_p1 = scmp.ne.s32.totalorder %s493_s25, %s494_s27  ;;  %p500_p8 = scmp.lt.s32.totalorder %s498_s8, %s494_s27 }
  0x34   : > { %v417_v17 = vld [vmem:[%s721_s2] ss:$0 sm:$0xff] }
  0x35   : > { %229 = vmatpush.msra.mxu0 %v218_v3  ;;  %p496_p3 = pnand %p495_p1, %p633_p13  ;;  %p501_p7 = por %p500_p8, %p499_p12 }
  0x37   : > { %230 = vmatpush.msra.mxu0 %v217_v4  ;;  %p497_p5 = pneg %p496_p3 }
  0x39   : > { %231 = vmatpush.msra.mxu0 %v216_v5  ;;  %p502_p9 = pnand %p501_p7, %p497_p5 }
  0x3b   : > { %232 = vmatpush.msra.mxu0 %v215_v6 }
  0x3d   : > { %233 = vmatpush.msra.mxu0 %v214_v7 }
  0x3f   : > { %234 = vmatpush.msra.mxu0 %v213_v8 }
  0x41   : > { %235 = vmatpush.msra.mxu0 %v212_v9 }
  0x43   : > { %236 = vmatpush.msra.mxu0 %v211_v10 }
  0x45   : > { %237 = vmatpush.msra.mxu0 %v210_v11 }
  0x47   : > { %238 = vmatpush.msra.mxu0 %v209_v12 }
  0x49   : > { %239 = vmatpush.msra.mxu0 %v208_v13 }
  0x4b   : > { %240 = vmatpush.msra.mxu0 %v207_v14 }
  0x4d   : > { %241 = vmatpush.msra.mxu0 %v206_v15 }
  0x4e   : > { %242 = vmatmul.f32.vlgmr.msra.gmra.mxu0 %v205_v16 }
  0xcb   : > { %v243_v18 = vpop.f32.mrf.mxu0 }
  0xcc   : > { %v244_v19 = vadd.f32 %v417_v17, %v243_v18 }
  0xce   : > { %v246_v20 = vadd.f32 %v244_v19, %v205_v16 }
  0xd0   : > { %247 = vst [vmem:[%s204_s22] sm:$0xff] %v246_v20 }
  0xd1   : > { %505 = shalt.err (!%p502_p9)
}
  0xd2   : > { %364 = dma.vmem_to_hbm [thread:$0]  (%p633_p13), %s262_s23, 128, %s264_s24, %s249_s19  }
  0xd3 PF: > { %s275_s5 = sand.u32 1, %s536_s12   ;;  %p728_p10 = scmp.ge.s32.totalorder %s548_s15, 2 }
  0xd4   : > { %s276_s11 = scalar_lea.sflag [#allocation4], %s275_s5 }
  0xd5   : > { %p375_p11 = pnand %p728_p10, %p638_p4 }
  0xd7   : > { %p376_p0 = pneg %p375_p11 }
  0xd9   : > { %531 = dma.done.wait (%p376_p0), %s276_s11, 128  }
  0xda   : > { %533 = vsyncadd (%p376_p0), %s276_s11, 4294967168  ;;  %p17_p2 = scmp.ge.s32.totalorder %s613_s26, 4   ;;  %s729_s12 = smov %s540_s13 }
  0xdb   : > { %s730_s13 = smov %s544_s14  ;;  %s731_s14 = smov %s625_s29 }
  0xdc   : > { %s732_s15 = smov %s613_s26  ;;  %19 = sbr.rel (!%p17_p2) target bundleno = 6 (0x6), region = 81 }
  0xe1   :  { %282 = vsyncpa [#allocation3], 1 }
  0xe2   :  { %284 = vsyncpa [#allocation3 + $0x1], 1 }
  0xe3   :  { %285 = vsyncpa [#allocation6], 1 }
  0xe4   :  { %286 = vsyncpa [#allocation4], 1 }
  0xe5   :  { %288 = vsyncpa [#allocation4 + $0x1], 1 }

</bundles_post_ra>
